<compile_context>
chip_gen: v5e
topology: v5e:2x2
jax: 0.10.0
libtpu: 0.0.40
codegen_flags: <defaults>
</compile_context>

<pallas_src>
import functools

import jax
import jax.numpy as jnp
from jax.experimental import pallas as pl
from jax.experimental.pallas import tpu as pltpu


def _round_up(x, m):
    return ((x + m - 1) // m) * m


# ----------------------------- Pallas kernels -------------------------------

def _proj_kernel(x_ref, w_ref, o_ref):
    # x_ref: (1, TMT, K) stacked features for one batch element / time tile
    # w_ref: (K, TN) pre-transposed projection weight tile
    # o_ref: (TMT, TN) output tile (written once; no accumulator needed when K untiled)
    o_ref[...] = jnp.dot(
        x_ref[0], w_ref[...], preferred_element_type=jnp.float32
    ).astype(o_ref.dtype)


def _proj_kernel_acc(x_ref, w_ref, o_ref, acc_ref):
    # Same as above but with the K reduction tiled over grid axis 3 (f32 accumulator).
    @pl.when(pl.program_id(3) == 0)
    def _init():
        acc_ref[...] = jnp.zeros_like(acc_ref)

    acc_ref[...] += jnp.dot(x_ref[0], w_ref[...], preferred_element_type=jnp.float32)

    @pl.when(pl.program_id(3) == pl.num_programs(3) - 1)
    def _store():
        o_ref[...] = acc_ref[...].astype(o_ref.dtype)


def _proj_pallas(x3d, w_kn, out_dtype, *, tm_max=1024, tn_max=1024, tk_max=1024):
    """x3d: [B, T_out, K] batch-major stacked features; w_kn: [K, E_out] (E_out % 128 == 0).

    Returns [T_out, B * E_out] so that reshape to [T_out, B, E_out] is a free view
    (no post-kernel transpose).  f32 accumulation on the MXU, cast to out_dtype on store.
    """
    B, t_out, K = x3d.shape
    K2, E_out = w_kn.shape
    assert K == K2
    assert E_out % 128 == 0, "weight output dim must be a multiple of 128"

    in_b = jnp.dtype(x3d.dtype).itemsize
    w_b = jnp.dtype(w_kn.dtype).itemsize
    out_b = jnp.dtype(out_dtype).itemsize

    # ---- N tile: full E_out when it fits, else largest 128-multiple divisor. ----
    if E_out <= tn_max:
        TN = E_out
    else:
        TN = (tn_max // 128) * 128
        while E_out % TN:
            TN -= 128
    n_blocks = E_out // TN

    # ---- K tile: NEVER ragged (padding garbage would corrupt valid outputs). ----
    if K > tk_max and K % 128 == 0:
        TK = (tk_max // 128) * 128
        while K % TK:
            TK -= 128
    else:
        TK = K
    k_tiles = K // TK

    # ---- Time tile. ----
    TMT = t_out if t_out <= tm_max else tm_max
    # v7x megacore: if the whole parallel grid would collapse to a single block, split
    # the time axis in two so both TensorCores get work.
    if B * n_blocks * pl.cdiv(t_out, TMT) == 1 and t_out >= 16:
        TMT = min(t_out, _round_up(pl.cdiv(t_out, 2), 16))

    # Keep the double-buffered footprint v7x-safe (64 MiB VMEM; stay well under).
    def _footprint(tmt):
        f = 2 * tmt * TK * in_b + 2 * TK * TN * w_b + 2 * tmt * TN * out_b
        if k_tiles > 1:
            f += tmt * TN * 4
        return f

    while _footprint(TMT) > (44 << 20) and TMT > 16:
        TMT = max(16, _round_up(TMT // 2, 16))
    t_tiles = pl.cdiv(t_out, TMT)

    cost = pl.CostEstimate(
        flops=2 * B * t_out * K * E_out,
        transcendentals=0,
        bytes_accessed=B * t_out * K * in_b + K * E_out * w_b + t_out * B * E_out * out_b,
    )
    # Explicit limit (margin over the tile footprint) so the budget does not depend on a
    # per-generation scoped default; capped at 48 MiB for v7x's 64 MiB VMEM.
    vmem_limit = int(max(24 << 20, min(_footprint(TMT) + (4 << 20), 48 << 20)))

    if k_tiles == 1:
        grid = (t_tiles, B, n_blocks)
        in_specs = [
            pl.BlockSpec((1, TMT, TK), lambda t, b, j: (b, t, 0)),
            pl.BlockSpec((TK, TN), lambda t, b, j: (0, j)),
        ]
        out_spec = pl.BlockSpec((TMT, TN), lambda t, b, j: (t, b * n_blocks + j))
        kernel = _proj_kernel
        scratch = []
        dims = ("parallel", "parallel", "parallel")
    else:
        grid = (t_tiles, B, n_blocks, k_tiles)
        in_specs = [
            pl.BlockSpec((1, TMT, TK), lambda t, b, j, k: (b, t, k)),
            pl.BlockSpec((TK, TN), lambda t, b, j, k: (k, j)),
        ]
        out_spec = pl.BlockSpec((TMT, TN), lambda t, b, j, k: (t, b * n_blocks + j))
        kernel = _proj_kernel_acc
        scratch = [pltpu.VMEM((TMT, TN), jnp.float32)]
        dims = ("parallel", "parallel", "parallel", "arbitrary")

    return pl.pallas_call(
        kernel,
        out_shape=jax.ShapeDtypeStruct((t_out, B * E_out), out_dtype),
        grid_spec=pltpu.PrefetchScalarGridSpec(
            num_scalar_prefetch=0,
            grid=grid,
            in_specs=in_specs,
            out_specs=out_spec,
            scratch_shapes=scratch,
        ),
        compiler_params=pltpu.CompilerParams(
            dimension_semantics=dims,
            vmem_limit_bytes=vmem_limit,
        ),
        cost_estimate=cost,
    )(x3d, w_kn)


# ----------------------------- Module wrapper -------------------------------

class StackSubsampler:
    """JAX/Pallas port of the PyTorch StackSubsampler (frame stack + bias-free Linear)."""

    def __init__(self, num_stack, input_feat_per_channel, input_channels,
                 encoder_embed_dim, key, compute_dtype=jnp.bfloat16, output_dtype=None):
        self.num_stack = num_stack
        self.encoder_embed_dim = encoder_embed_dim
        self.compute_dtype = compute_dtype
        self.output_dtype = compute_dtype if output_dtype is None else output_dtype
        in_features = input_feat_per_channel * input_channels * num_stack
        bound = 1.0 / float(in_features) ** 0.5
        # PyTorch nn.Linear weight layout [E, K]; kept in f32 for reference checks.
        self.proj_weight = jax.random.uniform(
            key, (encoder_embed_dim, in_features),
            minval=-bound, maxval=bound, dtype=jnp.float32)
        # Pre-transpose to [K, E] once at init.  Only pad the output dim when E is NOT
        # already a 128-multiple (avoids writing garbage columns + slice epilogue).
        e = encoder_embed_dim
        self.e_out = e if e % 128 == 0 else _round_up(e, 128)
        w_kn = self.proj_weight.T
        if self.e_out != e:
            w_kn = jnp.pad(w_kn, ((0, 0), (0, self.e_out - e)))
        self.w_kn = w_kn.astype(compute_dtype)

    @functools.partial(jax.jit, static_argnums=0)
    def __call__(self, src_tokens, src_lengths):
        # src_tokens: [B, T, D], src_lengths: [B]
        B, T, D = src_tokens.shape
        ns = self.num_stack
        pad = (-T) % ns

        # Cast BEFORE the time pad so the pad copy moves narrow bytes and pad+cast don't
        # become two separate HBM passes over the activation.
        x = src_tokens
        if x.dtype != self.compute_dtype:
            x = x.astype(self.compute_dtype)
        if pad:
            x = jnp.pad(x, ((0, 0), (0, pad), (0, 0)))
        t_out = (T + pad) // ns

        # Batch-major frame stacking: x3d[b, t', s*D + d] == src[b, t'*ns + s, d]
        # — a free contiguous reshape, no activation transposes.
        x3d = x.reshape(B, t_out, ns * D)

        # Kernel writes [t_out, B*E_out] directly -> reshape below is a free view.
        out2d = _proj_pallas(x3d, self.w_kn, self.output_dtype)
        out = out2d.reshape(t_out, B, self.e_out)
        if self.e_out != self.encoder_embed_dim:
            out = out[:, :, :self.encoder_embed_dim]  # only when E % 128 != 0

        # ceil(src_lengths / num_stack) via exact integer arithmetic.
        # TODO(synk): PyTorch returns int64; JAX default config has no x64 -> int32.
        new_lengths = ((src_lengths + ns - 1) // ns).astype(jnp.int32)
        return out, new_lengths


# ------------------- Pure-JAX reference (PyTorch semantics) ------------------

def reference_forward(src_tokens, src_lengths, proj_weight, num_stack):
    B, T, D = src_tokens.shape
    pad = (-T) % num_stack
    x = jnp.transpose(src_tokens, (1, 0, 2))                         # [T, B, D]
    x = jnp.pad(x, ((0, pad), (0, 0), (0, 0)))
    t_out = (T + pad) // num_stack
    x = x.reshape(t_out, num_stack, B, D)
    x = jnp.transpose(x, (1, 0, 2, 3))                               # [ns, T_out, B, D]
    x = jnp.concatenate([x[s] for s in range(num_stack)], axis=-1)   # [T_out, B, ns*D]
    out = jnp.einsum("tbk,ek->tbe", x, proj_weight,
                     precision=jax.lax.Precision.HIGHEST)
    lens = jnp.ceil(src_lengths.astype(jnp.float32) / num_stack).astype(jnp.int32)
    return out, lens


# --------------------------------- Main --------------------------------------

if __name__ == "__main__":
    key = jax.random.PRNGKey(0)
    k_w1, k_x1, k_w2, k_x2, k_w3, k_x3, k_w4, k_x4 = jax.random.split(key, 8)

    # Tolerances: "f32" checks are set to be robust to the MXU's pass decomposition of
    # f32 matmuls while still catching any layout/indexing/stacking bug; bf16 looser.
    F32_TOL = dict(atol=1e-2, rtol=1e-2)
    BF16_TOL = dict(atol=5e-2, rtol=5e-2)

    # --- Config 1: small module-consistent shapes (E=32 -> padded weight path) ---
    batch, src_time, feat, chans, ns, embed = 2, 7, 16, 1, 4, 32
    dim = feat * chans
    src_tokens = jax.random.normal(k_x1, (batch, src_time, dim), dtype=jnp.float32)
    src_lengths = jnp.array([7, 5], dtype=jnp.int32)

    m_f32 = StackSubsampler(ns, feat, chans, embed, k_w1,
                            compute_dtype=jnp.float32, output_dtype=jnp.float32)
    out, lens = m_f32(src_tokens, src_lengths)
    out = jax.block_until_ready(out)
    lens = jax.block_until_ready(lens)
    ref_out, ref_len = reference_forward(src_tokens, src_lengths, m_f32.proj_weight, ns)
    t1 = -(-src_time // ns)
    assert out.shape == (t1, batch, embed), out.shape
    assert out.dtype == jnp.float32
    assert jnp.allclose(out, ref_out, **F32_TOL)
    assert jnp.array_equal(lens, ref_len)

    # Same config with the default bf16 operands + bf16 output (f32 accumulation).
    m_bf16 = StackSubsampler(ns, feat, chans, embed, k_w1)
    out_b, lens_b = m_bf16(src_tokens, src_lengths)
    out_b = jax.block_until_ready(out_b)
    assert out_b.shape == (t1, batch, embed)
    assert out_b.dtype == jnp.bfloat16
    assert jnp.allclose(out_b.astype(jnp.float32), ref_out, **BF16_TOL)
    assert jnp.array_equal(lens_b, ref_len)

    # --- Config 2: E=640 (128-multiple: no padding, full-width TN), multi-batch grid ---
    b2, t2, d2, ns2, e2 = 8, 257, 16, 4, 640
    m2 = StackSubsampler(ns2, d2, 1, e2, k_w2)          # default bf16
    src2 = jax.random.normal(k_x2, (b2, t2, d2), dtype=jnp.float32)
    len2 = jnp.arange(1, b2 + 1, dtype=jnp.int32) * 32 + 1
    out2, olen2 = m2(src2, len2)
    out2 = jax.block_until_ready(out2)
    ref2, rlen2 = reference_forward(src2, len2, m2.proj_weight, ns2)
    t_out2 = (t2 + (-t2) % ns2) // ns2
    assert out2.shape == (t_out2, b2, e2), out2.shape
    assert m2.e_out == e2                                # no pad columns for E=640
    assert jnp.allclose(out2.astype(jnp.float32), ref2, **BF16_TOL)
    assert jnp.array_equal(olen2, rlen2)

    # --- Config 3: large K -> tiled reduction (accumulator kernel) + multiple N blocks ---
    b3, t3, d3, ns3, e3 = 2, 33, 320, 8, 2560            # K = 2560, E_out = 2560
    m3 = StackSubsampler(ns3, d3, 1, e3, k_w3,
                         compute_dtype=jnp.float32, output_dtype=jnp.float32)
    src3 = jax.random.normal(k_x3, (b3, t3, d3), dtype=jnp.float32)
    len3 = jnp.array([33, 17], dtype=jnp.int32)
    out3, olen3 = m3(src3, len3)
    out3 = jax.block_until_ready(out3)
    ref3, rlen3 = reference_forward(src3, len3, m3.proj_weight, ns3)
    t_out3 = (t3 + (-t3) % ns3) // ns3
    assert out3.shape == (t_out3, b3, e3), out3.shape
    assert jnp.allclose(out3, ref3, **F32_TOL)
    assert jnp.array_equal(olen3, rlen3)

    # --- Config 4: B=1 single-block grid -> megacore time split + ragged last t tile ---
    b4, t4, d4, ns4, e4 = 1, 77, 32, 2, 128
    m4 = StackSubsampler(ns4, d4, 1, e4, k_w4,
                         compute_dtype=jnp.float32, output_dtype=jnp.float32)
    src4 = jax.random.normal(k_x4, (b4, t4, d4), dtype=jnp.float32)
    len4 = jnp.array([77], dtype=jnp.int32)
    out4, olen4 = m4(src4, len4)
    out4 = jax.block_until_ready(out4)
    ref4, rlen4 = reference_forward(src4, len4, m4.proj_weight, ns4)
    t_out4 = (t4 + (-t4) % ns4) // ns4
    assert out4.shape == (t_out4, b4, e4), out4.shape
    assert jnp.allclose(out4, ref4, **F32_TOL)
    assert jnp.array_equal(olen4, rlen4)

    print("KERNEL_OK")
</pallas_src>

<mosaic_0001>
module attributes {stable_mosaic.version = 11 : i64} {
  func.func @_proj_kernel(%arg0: i32, %arg1: i32, %arg2: i32, %arg3: memref<1x2x64xf32, #tpu.memory_space<vmem>>, %arg4: memref<64x128xf32, #tpu.memory_space<vmem>>, %arg5: memref<2x128xf32, #tpu.memory_space<vmem>>) attributes {dimension_semantics = [#tpu.dimension_semantics<parallel>, #tpu.dimension_semantics<parallel>, #tpu.dimension_semantics<parallel>], iteration_bounds = array<i64: 1, 2, 1>, scalar_prefetch = 0 : i64, scratch_operands = 0 : i64, tpu.core_type = #tpu.core_type<tc>, window_params = [{transform_indices = @transform_0, window_bounds = array<i64: 1, 2, 64>}, {transform_indices = @transform_1, window_bounds = array<i64: 64, 128>}, {transform_indices = @transform_2, window_bounds = array<i64: 2, 128>}]} {
    %c0 = arith.constant 0 : index
    %c0_0 = arith.constant 0 : index
    %c0_1 = arith.constant 0 : index
    %0 = vector.load %arg3[%c0, %c0_0, %c0_1] : memref<1x2x64xf32, #tpu.memory_space<vmem>>, vector<1x2x64xf32>
    %1 = vector.shape_cast %0 : vector<1x2x64xf32> to vector<2x64xf32>
    %c0_2 = arith.constant 0 : index
    %c0_3 = arith.constant 0 : index
    %2 = vector.load %arg4[%c0_2, %c0_3] : memref<64x128xf32, #tpu.memory_space<vmem>>, vector<64x128xf32>
    %cst = arith.constant dense<0.000000e+00> : vector<2x128xf32>
    %3 = tpu.matmul %1, %2, %cst {dimension_numbers = #tpu.dot_dimension_numbers<[1], [0], [0], [1], [0, 0, 1, 1], [], []>} : vector<2x64xf32>, vector<64x128xf32>, vector<2x128xf32> -> vector<2x128xf32>
    %c0_4 = arith.constant 0 : index
    %c0_5 = arith.constant 0 : index
    %4 = vector.load %arg5[%c0_4, %c0_5] : memref<2x128xf32, #tpu.memory_space<vmem>>, vector<2x128xf32>
    tpu.vector_store %arg5[%c0_4, %c0_5], %3 {strides = array<i32>} : memref<2x128xf32, #tpu.memory_space<vmem>>, vector<2x128xf32>,
    return
  }
  func.func @transform_0(%arg0: i32, %arg1: i32, %arg2: i32) -> (i32, i32, i32) {
    %c0_i32 = arith.constant 0 : i32
    %c0_i32_0 = arith.constant 0 : i32
    return %arg1, %arg0, %c0_i32 : i32, i32, i32
  }
  func.func @transform_1(%arg0: i32, %arg1: i32, %arg2: i32) -> (i32, i32) {
    %c0_i32 = arith.constant 0 : i32
    %c0_i32_0 = arith.constant 0 : i32
    return %c0_i32, %arg2 : i32, i32
  }
  func.func @transform_2(%arg0: i32, %arg1: i32, %arg2: i32) -> (i32, i32) {
    %c1_i32 = arith.constant 1 : i32
    %0 = arith.muli %arg1, %c1_i32 : i32
    %1 = arith.addi %0, %arg2 : i32
    %c0_i32 = arith.constant 0 : i32
    return %arg0, %1 : i32, i32
  }
}

</mosaic_0001>

<bundles_post_ra>
// kernel: a_call__.1
= control target key start
LH: loop header
LB: loop body
LE: loop exit
PB: predicated region body
PF: predicated region fallthrough
CT: control target
= control target key end

     0   :  { %s411_s9 = smov 0   ;;  %s413_s10 = smov 0   ;;  %s468_s0 = inlined_call_operand.vmem [shape: f32[2,2,64], index: 0, kind: input, shape index: {}]   ;;  %s469_s1 = inlined_call_operand.vmem [shape: f32[64,128], index: 1, kind: input, shape index: {}]   ;;  %s470_s2 = inlined_call_operand.vmem [shape: f32[2,256], index: 2, kind: output, shape index: {}]  }
   0x1   :  { %s415_s11 = smov 0  }
   0x2 LB: > { %s27_s12 = sadd.s32 1, %s390_s10  ;;  %p342_p0 = scmp.ge.s32.totalorder %s394_s11, 1  ;;  %s394_s11 = sphi %s415_s11, %s12_s11   ;;  %s390_s10 = sphi %s413_s10, %s472_s10   ;;  %s386_s9 = sphi %s411_s9, %s471_s9  }
   0x3   : > { %p29_p1 = scmp.ge.s32.totalorder %s27_s12, 2  ;;  %p148_p2 = scmp.lt.s32.totalorder %s394_s11, 3 }
   0x5   : > { %s474_s12 = smov (%p29_p1, %s27_s12), 0  ;;  %p149_p3 = pnand %p342_p0, %p148_p2 }
   0x6   : > { %p180_p4 = scmp.lt.s32.totalorder (!%p149_p3), %s386_s9, 1 }
   0x7   : > { %152 = sbr.rel (%p149_p3) target bundleno = 155 (0x9b), region = 28 }
   0xc   : > { %v209_v0 = vld [vmem:[%s469_s1 + $0x38] sm:$0xff]  ;;  %v208_v1 = vld [vmem:[%s469_s1 + $0x30] sm:$0xff]  ;;  %v207_v2 = vld [vmem:[%s469_s1 + $0x28] sm:$0xff]  ;;  %s476_s9 = smov (!%p180_p4, %s386_s9), 1  ;;  %vm210_vm0 = vcmask 523264  }
   0xd   : > { %222 = vmatpush.msra.mxu0 %v209_v0  ;;  %v206_v3 = vld [vmem:[%s469_s1 + $0x20] sm:$0xff]  ;;  %v205_v4 = vld [vmem:[%s469_s1 + $0x18] sm:$0xff]  ;;  %s343_s23 = sshll.u32 %s476_s9, 1  ;;  %v204_v5 = vld [vmem:[%s469_s1 + $0x10] sm:$0xff] }
   0xe   : > { %v203_v6 = vld [vmem:[%s469_s1 + $0x8] sm:$0xff]  ;;  %s186_s30 = scalar_lea.vmem %s468_s0, %s343_s23  ;;  %v202_v7 = vld [vmem:[%s469_s1] sm:$0xff]  ;;  %s199_s7 = scalar_lea.vmem %s470_s2, %s343_s23 }
   0xf   : > { %223 = vmatpush.msra.mxu0 %v208_v1  ;;  %v201_v8 = vld [vmem:[%s186_s30] sm:$0x3] }
  0x11   : > { %224 = vmatpush.msra.mxu0 %v207_v2 }
  0x13   : > { %225 = vmatpush.msra.mxu0 %v206_v3 }
  0x15   : > { %226 = vmatpush.msra.mxu0 %v205_v4 }
  0x17   : > { %227 = vmatpush.msra.mxu0 %v204_v5 }
  0x19   : > { %228 = vmatpush.msra.mxu0 %v203_v6 }
  0x1b   : > { %229 = vmatpush.msra.mxu0 %v202_v7 }
  0x1c   : > { %345 = vmatmul.msk.f32.vlgmr.msra.gmra.mxu0 %vm210_vm0, %v201_v8 }
  0x99   : > { %v231_v9 = vpop.f32.mrf.mxu0 }
  0x9a   : > { %234 = vst [vmem:[%s199_s7] sm:$0x3] %v231_v9 }
  0x9b PF: > { %s12_s11 = sadd.s32 1, %s394_s11   ;;  %s471_s9 = smov %s390_s10 }
  0x9c   : > { %p9_p5 = scmp.ge.s32.totalorder %s12_s11, 4   ;;  %s472_s10 = smov %s474_s12 }
  0x9e   :  { %11 = sbr.rel (!%p9_p5) target bundleno = 2 (0x2), region = 61 }

</bundles_post_ra>
